<compile_context>
chip_gen: v7x
topology: tpu7x:2x2x1
jax: 0.10.0
libtpu: 0.0.40
codegen_flags: <defaults>
</compile_context>

<pallas_src>
import jax
import jax.numpy as jnp
from jax.experimental import pallas as pl
from jax.experimental.pallas import tpu as pltpu


# ---------------------------------------------------------------------------
# Kernel: one grid step = one (batch element, prediction slice) pair.
# Layout inside the kernel: images are (C*H, Wp); row r = c*H + h, lane j = w.
# ---------------------------------------------------------------------------
def _make_loss_kernel(C, H, W, Wp, cdtype):
    CH = C * H

    def kernel(pred0_ref, predi_ref, gt_ref, out_ref, gt_grad_ref):
        s = pl.program_id(1)   # slice index 0..N (inner, "arbitrary" axis)

        # Tiny 0/1 masks generated in-kernel (no HBM streams, negligible VALU).
        lane = jax.lax.broadcasted_iota(jnp.int32, (1, Wp), 1)
        wmask = ((lane > 0) & (lane < W)).astype(cdtype)    # 0 at w==0 and pad
        row = jax.lax.broadcasted_iota(jnp.int32, (CH, 1), 0)
        hmask = ((row % H) != 0).astype(cdtype)             # 0 at h==0 rows

        def grad_l1(x):
            # TensorGradient(L1=True): |x[h,w-1]-x[h,w]| + |x[h-1,w]-x[h,w]|
            # with out-of-image neighbours = 0 (masks also zero the pad lanes).
            left = pltpu.roll(x, shift=1, axis=1) * wmask   # lane roll  (XLU)
            up = pltpu.roll(x, shift=1, axis=0) * hmask     # sublane roll (XLU)
            return jnp.abs(left - x) + jnp.abs(up - x)

        gt_raw = gt_ref[0]                                  # (CH, Wp)
        gt32 = gt_raw.astype(jnp.float32)

        def emit(pred_raw, gt_grad):
            # Gradient / L1 path in the compute dtype; MSE diff + sums in f32.
            pred_c = pred_raw.astype(cdtype)
            l1 = jnp.abs(grad_l1(pred_c) - gt_grad).astype(jnp.float32)
            d = pred_raw.astype(jnp.float32) - gt32
            out_ref[...] = jnp.sum(d * d + l1, axis=0,
                                   keepdims=True).reshape(1, 1, 1, Wp)

        # Slice 0: basic loss on pred_img; also compute gt's gradient for this
        # batch element and keep it resident in VMEM for slices 1..N.
        @pl.when(s == 0)
        def _():
            g = grad_l1(gt_raw.astype(cdtype))
            gt_grad_ref[...] = g
            emit(pred0_ref[0], g)

        # Slices 1..N: anneal-loss terms on pred_img_i[:, s-1].
        @pl.when(s != 0)
        def _():
            emit(predi_ref[0, 0], gt_grad_ref[...])

    return kernel


def _per_slice_loss_sums(pred_img_i, pred_img, ground_truth):
    """Returns (B, N+1, 1, Wp) f32 per-lane partial sums of (pred-gt)^2 +
    |grad(pred)-grad(gt)|.  Slice 0 -> pred_img; slices 1..N -> pred_img_i."""
    B, N, C, H, W = pred_img_i.shape
    CH = C * H
    Wp = pl.cdiv(W, 128) * 128
    num_slices = N + 1
    cdtype = jnp.promote_types(jnp.promote_types(pred_img_i.dtype,
                                                 pred_img.dtype),
                               ground_truth.dtype)

    # Free, contiguous reshapes (no transpose); native dtype stays in HBM.
    predi = pred_img_i.reshape(B, N, CH, W)
    pred0 = pred_img.reshape(B, CH, W)
    gt = ground_truth.reshape(B, CH, W)

    if Wp != W:
        # Zero-pad the lane axis to a multiple of 128 so the in-kernel lane
        # roll never needs a slow concatenate fallback.  Padded lanes are
        # masked so they contribute exactly 0.  No-op for production widths.
        predi = jnp.pad(predi, ((0, 0), (0, 0), (0, 0), (0, Wp - W)))
        pred0 = jnp.pad(pred0, ((0, 0), (0, 0), (0, Wp - W)))
        gt = jnp.pad(gt, ((0, 0), (0, 0), (0, Wp - W)))

    # VMEM footprint: double-buffered blocks for the three image streams and
    # the tiny output row, plus the resident gt-gradient scratch.
    blk = CH * Wp
    in_bytes = blk * (predi.dtype.itemsize + pred0.dtype.itemsize
                      + gt.dtype.itemsize)
    footprint = 2 * (in_bytes + Wp * 4) + blk * jnp.dtype(cdtype).itemsize
    # Cap at 64 MiB so the request is valid on v7x as well as v5e/v6e.
    vmem_limit = int(min(max(2 * footprint, 16 << 20), 64 << 20))
    # TODO(synk): image tiling (extra grid axis, 1-row halo) for frames whose
    # footprint exceeds v7x's 64 MiB VMEM.

    cost = pl.CostEstimate(
        flops=int(16 * B * num_slices * CH * Wp),
        transcendentals=0,
        bytes_accessed=int(predi.size * predi.dtype.itemsize
                           + pred0.size * pred0.dtype.itemsize
                           + gt.size * gt.dtype.itemsize
                           + B * num_slices * Wp * 4),
    )

    sums = pl.pallas_call(
        _make_loss_kernel(C, H, W, Wp, cdtype),
        grid=(B, num_slices),
        in_specs=[
            # pred_img: block index constant over s -> DMA'd once per b.
            pl.BlockSpec((1, CH, Wp), lambda b, s: (b, 0, 0)),
            # pred_img_i[:, s-1]; the s==0 fetch aliases s==1's block, so every
            # input byte is still DMA'd exactly once.
            pl.BlockSpec((1, 1, CH, Wp),
                         lambda b, s: (b, jnp.maximum(s - 1, 0), 0, 0)),
            # ground truth: constant over s -> DMA'd once per b.
            pl.BlockSpec((1, CH, Wp), lambda b, s: (b, 0, 0)),
        ],
        out_specs=pl.BlockSpec((1, 1, 1, Wp), lambda b, s: (b, s, 0, 0)),
        out_shape=jax.ShapeDtypeStruct((B, num_slices, 1, Wp), jnp.float32),
        scratch_shapes=[pltpu.VMEM((CH, Wp), cdtype)],   # grad(gt), per-b
        compiler_params=pltpu.CompilerParams(
            # Batch axis "parallel" (v7x: 2 TensorCores).  The slice axis must
            # stay "arbitrary": the gt-gradient scratch is carried across it
            # and initialized at s == 0 for every b.
            dimension_semantics=("parallel", "arbitrary"),
            vmem_limit_bytes=vmem_limit,
        ),
        cost_estimate=cost,
    )(pred0, predi, gt)
    return sums


def loss_func(pred_img_i, pred_img, ground_truth, global_step,
              coeff_basic=1.0, coeff_anneal=1.0, alpha=0.9998, beta=100.0):
    """JAX/Pallas equivalent of LossFunc.forward.

    pred_img_i:   (B, N, C, H, W)
    pred_img:     (B, C, H, W)
    ground_truth: (B, C, H, W)
    global_step:  python int
    Returns (coeff_basic * loss_basic, coeff_anneal * loss_anneal) f32 scalars.
    """
    B, N, C, H, W = pred_img_i.shape
    sums = _per_slice_loss_sums(pred_img_i, pred_img, ground_truth)

    n_elem = jnp.float32(B * C * H * W)          # reduction='mean' denominator
    per_slice = jnp.sum(sums, axis=(0, 2, 3)) / n_elem   # mse_mean + gradL1_mean

    loss_basic = coeff_basic * per_slice[0]
    loss_anneal = (coeff_anneal * beta * (alpha ** global_step)
                   * jnp.mean(per_slice[1:]))
    return loss_basic, loss_anneal


# ---------------------------------------------------------------------------
# Pure-JAX reference (correctness check only).
# ---------------------------------------------------------------------------
def _grad_l1_ref(x):
    Wd = x.shape[-1]
    Hd = x.shape[-2]
    l = jnp.pad(x, ((0, 0), (0, 0), (0, 0), (1, 0)))[..., :Wd]
    u = jnp.pad(x, ((0, 0), (0, 0), (1, 0), (0, 0)))[..., :Hd, :]
    return jnp.abs(l - x) + jnp.abs(u - x)


def _basic_ref(pred, gt):
    mse = jnp.mean((pred - gt) ** 2)
    gl1 = jnp.mean(jnp.abs(_grad_l1_ref(pred) - _grad_l1_ref(gt)))
    return mse + gl1


if __name__ == "__main__":
    # LossFunc has no learned weights, only fixed coefficients.
    coeff_basic, coeff_anneal, alpha, beta = 1.0, 1.0, 0.9998, 100.0

    B, N, C, H, W = 2, 4, 3, 16, 16
    global_step = 100

    key = jax.random.PRNGKey(0)
    k1, k2, k3 = jax.random.split(key, 3)
    pred_img_i = jax.random.normal(k1, (B, N, C, H, W), jnp.float32)
    pred_img = jax.random.normal(k2, (B, C, H, W), jnp.float32)
    ground_truth = jax.random.normal(k3, (B, C, H, W), jnp.float32)

    loss_basic, loss_anneal = loss_func(
        pred_img_i, pred_img, ground_truth, global_step,
        coeff_basic=coeff_basic, coeff_anneal=coeff_anneal,
        alpha=alpha, beta=beta,
    )
    jax.block_until_ready((loss_basic, loss_anneal))

    # Reference check.
    ref_basic = coeff_basic * _basic_ref(pred_img, ground_truth)
    ref_anneal = (coeff_anneal * beta * (alpha ** global_step)
                  * jnp.mean(jnp.stack(
                      [_basic_ref(pred_img_i[:, i], ground_truth)
                       for i in range(N)])))
    assert jnp.allclose(loss_basic, ref_basic, rtol=1e-4, atol=1e-5), \
        (loss_basic, ref_basic)
    assert jnp.allclose(loss_anneal, ref_anneal, rtol=1e-4, atol=1e-4), \
        (loss_anneal, ref_anneal)

    print("KERNEL_OK")
</pallas_src>

<mosaic_0001>
module attributes {stable_mosaic.version = 11 : i64} {
  func.func @kernel(%arg0: i32, %arg1: i32, %arg2: memref<1x48x128xf32, #tpu.memory_space<vmem>>, %arg3: memref<1x1x48x128xf32, #tpu.memory_space<vmem>>, %arg4: memref<1x48x128xf32, #tpu.memory_space<vmem>>, %arg5: memref<1x1x1x128xf32, #tpu.memory_space<vmem>>, %arg6: memref<48x128xf32, #tpu.memory_space<vmem>>) attributes {dimension_semantics = [#tpu.dimension_semantics<parallel>, #tpu.dimension_semantics<arbitrary>], iteration_bounds = array<i64: 2, 5>, scalar_prefetch = 0 : i64, scratch_operands = 1 : i64, tpu.core_type = #tpu.core_type<tc>, window_params = [{transform_indices = @transform_0, window_bounds = array<i64: 1, 48, 128>}, {transform_indices = @transform_1, window_bounds = array<i64: 1, 1, 48, 128>}, {transform_indices = @transform_2, window_bounds = array<i64: 1, 48, 128>}, {transform_indices = @transform_3, window_bounds = array<i64: 1, 1, 1, 128>}]} {
    %0 = tpu.iota {dimensions = array<i32: 1>} : vector<1x128xi32>
    %c0_i32 = arith.constant 0 : i32
    %1 = vector.broadcast %c0_i32 : i32 to vector<1x128xi32>
    %2 = arith.cmpi sgt, %0, %1 : vector<1x128xi32>
    %c16_i32 = arith.constant 16 : i32
    %3 = vector.broadcast %c16_i32 : i32 to vector<1x128xi32>
    %4 = arith.cmpi slt, %0, %3 : vector<1x128xi32>
    %5 = arith.andi %2, %4 : vector<1x128xi1>
    %6 = arith.extui %5 : vector<1x128xi1> to vector<1x128xi32>
    %7 = arith.sitofp %6 : vector<1x128xi32> to vector<1x128xf32>
    %8 = tpu.iota {dimensions = array<i32: 0>} : vector<48x1xi32>
    %c16_i32_0 = arith.constant 16 : i32
    %c0_i32_1 = arith.constant 0 : i32
    %9 = arith.cmpi eq, %c16_i32_0, %c0_i32_1 : i32
    %c1_i32 = arith.constant 1 : i32
    %10 = arith.select %9, %c1_i32, %c16_i32_0 : i32
    %11 = vector.broadcast %10 : i32 to vector<48x1xi32>
    %12 = arith.remsi %8, %11 : vector<48x1xi32>
    %c0_i32_2 = arith.constant 0 : i32
    %13 = vector.broadcast %c0_i32_2 : i32 to vector<48x1xi32>
    %14 = arith.cmpi ne, %12, %13 : vector<48x1xi32>
    %c0_i32_3 = arith.constant 0 : i32
    %15 = vector.broadcast %c0_i32_3 : i32 to vector<48x1xi32>
    %16 = arith.cmpi slt, %12, %15 : vector<48x1xi32>
    %c0_i32_4 = arith.constant 0 : i32
    %17 = arith.cmpi slt, %10, %c0_i32_4 : i32
    %18 = vector.broadcast %17 : i1 to vector<48x1xi1>
    %19 = vector.broadcast %18 : vector<48x1xi1> to vector<48x1xi1>
    %20 = arith.xori %16, %19 : vector<48x1xi1>
    %21 = arith.andi %20, %14 : vector<48x1xi1>
    %22 = vector.broadcast %10 : i32 to vector<48x1xi32>
    %23 = arith.addi %12, %22 : vector<48x1xi32>
    %24 = arith.select %21, %23, %12 : vector<48x1xi1>, vector<48x1xi32>
    %c0_i32_5 = arith.constant 0 : i32
    %25 = vector.broadcast %c0_i32_5 : i32 to vector<48x1xi32>
    %26 = arith.cmpi ne, %24, %25 : vector<48x1xi32>
    %27 = arith.extui %26 : vector<48x1xi1> to vector<48x1xi32>
    %28 = arith.sitofp %27 : vector<48x1xi32> to vector<48x1xf32>
    %c0 = arith.constant 0 : index
    %c0_6 = arith.constant 0 : index
    %c0_7 = arith.constant 0 : index
    %29 = vector.load %arg4[%c0, %c0_6, %c0_7] : memref<1x48x128xf32, #tpu.memory_space<vmem>>, vector<1x48x128xf32>
    %30 = vector.shape_cast %29 : vector<1x48x128xf32> to vector<48x128xf32>
    %c0_i32_8 = arith.constant 0 : i32
    %31 = arith.cmpi eq, %arg1, %c0_i32_8 : i32
    %32 = arith.extui %31 : i1 to i32
    %c0_i32_9 = arith.constant 0 : i32
    %33 = arith.cmpi ne, %32, %c0_i32_9 : i32
    scf.if %33 {
      %c1_i32_12 = arith.constant 1 : i32
      %37 = tpu.dynamic_rotate %30 by %c1_i32_12 dim 1 : vector<48x128xf32>, i32 -> vector<48x128xf32>
      %38 = vector.broadcast %7 : vector<1x128xf32> to vector<48x128xf32>
      %39 = arith.mulf %37, %38 : vector<48x128xf32>
      %c1_i32_13 = arith.constant 1 : i32
      %40 = tpu.dynamic_rotate %30 by %c1_i32_13 dim 0 : vector<48x128xf32>, i32 -> vector<48x128xf32>
      %41 = vector.broadcast %28 : vector<48x1xf32> to vector<48x128xf32>
      %42 = arith.mulf %40, %41 : vector<48x128xf32>
      %43 = arith.subf %39, %30 : vector<48x128xf32>
      %44 = math.absf %43 : vector<48x128xf32>
      %45 = arith.subf %42, %30 : vector<48x128xf32>
      %46 = math.absf %45 : vector<48x128xf32>
      %47 = arith.addf %44, %46 : vector<48x128xf32>
      %c0_14 = arith.constant 0 : index
      %c0_15 = arith.constant 0 : index
      %48 = vector.load %arg6[%c0_14, %c0_15] : memref<48x128xf32, #tpu.memory_space<vmem>>, vector<48x128xf32>
      tpu.vector_store %arg6[%c0_14, %c0_15], %47 {strides = array<i32>} : memref<48x128xf32, #tpu.memory_space<vmem>>, vector<48x128xf32>,
      %c0_16 = arith.constant 0 : index
      %c0_17 = arith.constant 0 : index
      %c0_18 = arith.constant 0 : index
      %49 = vector.load %arg2[%c0_16, %c0_17, %c0_18] : memref<1x48x128xf32, #tpu.memory_space<vmem>>, vector<1x48x128xf32>
      %50 = vector.shape_cast %49 : vector<1x48x128xf32> to vector<48x128xf32>
      %c1_i32_19 = arith.constant 1 : i32
      %51 = tpu.dynamic_rotate %50 by %c1_i32_19 dim 1 : vector<48x128xf32>, i32 -> vector<48x128xf32>
      %52 = vector.broadcast %7 : vector<1x128xf32> to vector<48x128xf32>
      %53 = arith.mulf %51, %52 : vector<48x128xf32>
      %c1_i32_20 = arith.constant 1 : i32
      %54 = tpu.dynamic_rotate %50 by %c1_i32_20 dim 0 : vector<48x128xf32>, i32 -> vector<48x128xf32>
      %55 = vector.broadcast %28 : vector<48x1xf32> to vector<48x128xf32>
      %56 = arith.mulf %54, %55 : vector<48x128xf32>
      %57 = arith.subf %53, %50 : vector<48x128xf32>
      %58 = math.absf %57 : vector<48x128xf32>
      %59 = arith.subf %56, %50 : vector<48x128xf32>
      %60 = math.absf %59 : vector<48x128xf32>
      %61 = arith.addf %58, %60 : vector<48x128xf32>
      %62 = arith.subf %61, %47 : vector<48x128xf32>
      %63 = math.absf %62 : vector<48x128xf32>
      %64 = arith.subf %50, %30 : vector<48x128xf32>
      %65 = arith.mulf %64, %64 : vector<48x128xf32>
      %66 = arith.addf %65, %63 : vector<48x128xf32>
      %cst = arith.constant dense<0.000000e+00> : vector<128xf32>
      %67 = vector.multi_reduction <add>, %66, %cst [0] : vector<48x128xf32> to vector<128xf32>
      %68 = vector.shape_cast %67 : vector<128xf32> to vector<1x128xf32>
      %69 = vector.shape_cast %68 : vector<1x128xf32> to vector<1x1x1x128xf32>
      %c0_21 = arith.constant 0 : index
      %c0_22 = arith.constant 0 : index
      %c0_23 = arith.constant 0 : index
      %c0_24 = arith.constant 0 : index
      %70 = vector.load %arg5[%c0_21, %c0_22, %c0_23, %c0_24] : memref<1x1x1x128xf32, #tpu.memory_space<vmem>>, vector<1x1x1x128xf32>
      tpu.vector_store %arg5[%c0_21, %c0_22, %c0_23, %c0_24], %69 {strides = array<i32>} : memref<1x1x1x128xf32, #tpu.memory_space<vmem>>, vector<1x1x1x128xf32>,
    } else {
    }
    %c0_i32_10 = arith.constant 0 : i32
    %34 = arith.cmpi ne, %arg1, %c0_i32_10 : i32
    %35 = arith.extui %34 : i1 to i32
    %c0_i32_11 = arith.constant 0 : i32
    %36 = arith.cmpi ne, %35, %c0_i32_11 : i32
    scf.if %36 {
      %c0_12 = arith.constant 0 : index
      %c0_13 = arith.constant 0 : index
      %c0_14 = arith.constant 0 : index
      %c0_15 = arith.constant 0 : index
      %37 = vector.load %arg3[%c0_12, %c0_13, %c0_14, %c0_15] : memref<1x1x48x128xf32, #tpu.memory_space<vmem>>, vector<1x1x48x128xf32>
      %38 = vector.shape_cast %37 : vector<1x1x48x128xf32> to vector<48x128xf32>
      %c0_16 = arith.constant 0 : index
      %c0_17 = arith.constant 0 : index
      %39 = vector.load %arg6[%c0_16, %c0_17] : memref<48x128xf32, #tpu.memory_space<vmem>>, vector<48x128xf32>
      %c1_i32_18 = arith.constant 1 : i32
      %40 = tpu.dynamic_rotate %38 by %c1_i32_18 dim 1 : vector<48x128xf32>, i32 -> vector<48x128xf32>
      %41 = vector.broadcast %7 : vector<1x128xf32> to vector<48x128xf32>
      %42 = arith.mulf %40, %41 : vector<48x128xf32>
      %c1_i32_19 = arith.constant 1 : i32
      %43 = tpu.dynamic_rotate %38 by %c1_i32_19 dim 0 : vector<48x128xf32>, i32 -> vector<48x128xf32>
      %44 = vector.broadcast %28 : vector<48x1xf32> to vector<48x128xf32>
      %45 = arith.mulf %43, %44 : vector<48x128xf32>
      %46 = arith.subf %42, %38 : vector<48x128xf32>
      %47 = math.absf %46 : vector<48x128xf32>
      %48 = arith.subf %45, %38 : vector<48x128xf32>
      %49 = math.absf %48 : vector<48x128xf32>
      %50 = arith.addf %47, %49 : vector<48x128xf32>
      %51 = arith.subf %50, %39 : vector<48x128xf32>
      %52 = math.absf %51 : vector<48x128xf32>
      %53 = arith.subf %38, %30 : vector<48x128xf32>
      %54 = arith.mulf %53, %53 : vector<48x128xf32>
      %55 = arith.addf %54, %52 : vector<48x128xf32>
      %cst = arith.constant dense<0.000000e+00> : vector<128xf32>
      %56 = vector.multi_reduction <add>, %55, %cst [0] : vector<48x128xf32> to vector<128xf32>
      %57 = vector.shape_cast %56 : vector<128xf32> to vector<1x128xf32>
      %58 = vector.shape_cast %57 : vector<1x128xf32> to vector<1x1x1x128xf32>
      %c0_20 = arith.constant 0 : index
      %c0_21 = arith.constant 0 : index
      %c0_22 = arith.constant 0 : index
      %c0_23 = arith.constant 0 : index
      %59 = vector.load %arg5[%c0_20, %c0_21, %c0_22, %c0_23] : memref<1x1x1x128xf32, #tpu.memory_space<vmem>>, vector<1x1x1x128xf32>
      tpu.vector_store %arg5[%c0_20, %c0_21, %c0_22, %c0_23], %58 {strides = array<i32>} : memref<1x1x1x128xf32, #tpu.memory_space<vmem>>, vector<1x1x1x128xf32>,
    } else {
    }
    return
  }
  func.func @transform_0(%arg0: i32, %arg1: i32) -> (i32, i32, i32) {
    %c0_i32 = arith.constant 0 : i32
    %c0_i32_0 = arith.constant 0 : i32
    %c0_i32_1 = arith.constant 0 : i32
    return %arg0, %c0_i32, %c0_i32_0 : i32, i32, i32
  }
  func.func @transform_1(%arg0: i32, %arg1: i32) -> (i32, i32, i32, i32) {
    %c1_i32 = arith.constant 1 : i32
    %0 = arith.subi %arg1, %c1_i32 : i32
    %c0_i32 = arith.constant 0 : i32
    %1 = arith.maxsi %0, %c0_i32 : i32
    %c0_i32_0 = arith.constant 0 : i32
    %c0_i32_1 = arith.constant 0 : i32
    %c0_i32_2 = arith.constant 0 : i32
    return %arg0, %1, %c0_i32_0, %c0_i32_1 : i32, i32, i32, i32
  }
  func.func @transform_2(%arg0: i32, %arg1: i32) -> (i32, i32, i32) {
    %c0_i32 = arith.constant 0 : i32
    %c0_i32_0 = arith.constant 0 : i32
    %c0_i32_1 = arith.constant 0 : i32
    return %arg0, %c0_i32, %c0_i32_0 : i32, i32, i32
  }
  func.func @transform_3(%arg0: i32, %arg1: i32) -> (i32, i32, i32, i32) {
    %c0_i32 = arith.constant 0 : i32
    %c0_i32_0 = arith.constant 0 : i32
    %c0_i32_1 = arith.constant 0 : i32
    return %arg0, %arg1, %c0_i32, %c0_i32_0 : i32, i32, i32, i32
  }
}

</mosaic_0001>

<bundles_post_ra>
// kernel: tpu_custom_call.1
= control target key start
LH: loop header
LB: loop body
LE: loop exit
PB: predicated region body
PF: predicated region fallthrough
CT: control target
= control target key end

     0   :  { %s1932_s0 = inlined_call_operand.hbm [shape: f32[2,48,128], index: 0, kind: input, shape index: {}]   ;;  %s1933_s1 = inlined_call_operand.hbm [shape: f32[2,4,48,128], index: 1, kind: input, shape index: {}]   ;;  %s1934_s2 = inlined_call_operand.hbm [shape: f32[2,48,128], index: 2, kind: input, shape index: {}]   ;;  %s1935_s3 = inlined_call_operand.hbm [shape: f32[2,5,1,128], index: 3, kind: output, shape index: {}]  }
   0x1   :  { %1955 = sst [smem:[#allocation26_spill]] %s1933_s1 }
   0x2   :  { %8 = vsyncpa [#allocation4], 0 }
   0x3   :  { %10 = vsyncpa [#allocation4 + $0x1], 0 }
   0x4   :  { %11 = vsyncpa [#allocation7], 0 }
   0x5   :  { %13 = vsyncpa [#allocation7 + $0x1], 0 }
   0x6   :  { %14 = vsyncpa [#allocation5], 0 }
   0x7   :  { %16 = vsyncpa [#allocation5 + $0x1], 0  ;;  %s1307_s12 = smov 0   ;;  %s1309_s13 = smov 0  }
   0x8   :  { %s1311_s14 = smov 0   ;;  %s1313_s15 = smov 0  }
   0x9   :  { %s1315_s16 = smov 0   ;;  %s1317_s17 = smov 0  }
   0xa   :  { %s1319_s18 = smov 0   ;;  %s1321_s19 = smov 0  }
   0xb   :  { %s1323_s20 = smov 0   ;;  %s1325_s21 = smov 0  }
   0xc   :  { %s1327_s22 = smov 0   ;;  %s1329_s23 = smov 0  }
   0xd   :  { %s1331_s24 = smov 0   ;;  %s1333_s25 = smov 0  }
   0xe LB: > { %1956 = sst [smem:[#allocation14_spill]] %s1224_s12  ;;  %s1378_s26 = sadd.s32 4294967295, %s1276_s25   ;;  %s1276_s25 = sphi %s1333_s25, %s22_s25   ;;  %s1272_s24 = sphi %s1331_s24, %s2010_s24   ;;  %s1268_s23 = sphi %s1329_s23, %s2001_s23   ;;  %s1264_s22 = sphi %s1327_s22, %s2000_s22   ;;  %s1260_s21 = sphi %s1325_s21, %s1999_s21   ;;  %s1256_s20 = sphi %s1323_s20, %s1998_s20   ;;  %s1252_s19 = sphi %s1321_s19, %s2009_s19   ;;  %s1248_s18 = sphi %s1319_s18, %s2008_s18   ;;  %s1244_s17 = sphi %s1317_s17, %s1996_s17   ;;  %s1240_s16 = sphi %s1315_s16, %s2007_s16   ;;  %s1236_s15 = sphi %s1313_s15, %s2006_s15   ;;  %s1232_s14 = sphi %s1311_s14, %s1994_s14   ;;  %s1228_s13 = sphi %s1309_s13, %s2005_s13   ;;  %s1224_s12 = sphi %s1307_s12, %s2004_s12  }
   0xf   : > { %1957 = sst [smem:[#allocation15_spill]] %s1232_s14  ;;  %s31_s28 = sadd.s32 1, %s1268_s23 }
  0x10   : > { %1958 = sst [smem:[#allocation16_spill]] %s1244_s17  ;;  %s34_s29 = sadd.s32 1, %s1272_s24 }
  0x11   : > { %1959 = sst [smem:[#allocation17_spill]] %s1256_s20  ;;  %p32_p0 = scmp.ge.s32.totalorder %s31_s28, 5 }
  0x12   : > { %1960 = sst [smem:[#allocation18_spill]] %s1268_s23  ;;  %p1945_p1 = scmp.eq.s32.totalorder %s1276_s25, 0 }
  0x13   : > { %1961 = sst [smem:[#allocation19_spill]] %s1272_s24  ;;  %p1944_p2 = scmp.eq.s32.totalorder %s1378_s26, 0 }
  0x14   : > { %s863_s30 = sadd.s32 4294967295, %s1268_s23  ;;  %s2012_s28 = smov (%p32_p0, %s31_s28), 0 }
  0x15   : > { %1962 = sst [smem:[#allocation20_spill]] %s2012_s28  ;;  %s2014_s29 = smov (!%p32_p0, %s34_s29), %s1272_s24 }
  0x16   : > { %p65_p3 = scmp.gt.s32.totalorder %s863_s30, 0  ;;  %s864_s4 = sadd.s32 4294967295, %s2012_s28 }
  0x17   : > { %p36_p4 = scmp.ge.s32.totalorder %s2014_s29, 2  ;;  %p68_p5 = scmp.gt.s32.totalorder %s864_s4, 0 }
  0x18   : > { %s2016_s30 = smov (!%p65_p3, %s863_s30), 0  ;;  %s75_s6 = sadd.s32 1, %s1244_s17 }
  0x19   : > { %s2018_s29 = smov (%p36_p4, %s2014_s29), 0  ;;  %s2020_s4 = smov (!%p68_p5, %s864_s4), 0 }
  0x1a   : > { %1963 = sst [smem:[#allocation21_spill]] %s2018_s29  ;;  %s1396_s5 = ssub.s32 %s1272_s24, %s2018_s29 }
  0x1b   : > { %s71_s7 = ssub.s32 %s2016_s30, %s2020_s4  ;;  %p82_p7 = scmp.ne.s32.totalorder %s1244_s17, %s1240_s16 }
  0x1c   : > { %s72_s8 = sor.u32 %s71_s7, %s1396_s5  ;;  %p88_p9 = scmp.ne.s32.totalorder %s1240_s16, %s1236_s15 }
  0x1d   : > { %p73_p8 = scmp.eq.s32.totalorder %s72_s8, 0  ;;  %p1408_p10 = por %p82_p7, %p1945_p1 }
  0x1e   : > { %s125_s10 = ssub.s32 %s1268_s23, %s2012_s28  ;;  %p1419_p11 = por %p88_p9, %p1944_p2 }
  0x1f   : > { %s1415_s11 = scalar_select %p73_p8, %s1244_s17, %s75_s6  }
  0x20   : > { %s1966_s4 = scalar_select %p1419_p11, 1, 0 }
  0x21   : > { %1965 = sst [smem:[#allocation22_spill]] %s1415_s11  ;;  %s126_s7 = sor.u32 %s125_s10, %s1396_s5 }
  0x22   : > { %p127_p12 = scmp.eq.s32.totalorder %s126_s7, 0  ;;  %s129_s15 = sadd.s32 1, %s1232_s14 }
  0x23   : > { %p139_p13 = scmp.ne.s32.totalorder %s1232_s14, %s1228_s13  ;;  %p140_p0 = scmp.eq.s32.totalorder %s1378_s26, 9 }
  0x24   : > { %s1429_s8 = scalar_select %p127_p12, %s1232_s14, %s129_s15  }
  0x25   : > { %p1431_p3 = por %p140_p0, %p139_p13  ;;  %p145_p4 = scmp.ne.s32.totalorder %s1228_s13, %s1224_s12 }
  0x26   : > { %1967 = sst [smem:[#allocation23_spill]] %s1429_s8  ;;  %s1969_s6 = sadd.s32 4294967294, %s1276_s25  }
  0x27   : > { %s1968_s27 = scalar_select %p1431_p3, 1, 0 }
  0x28   : > { %p146_p5 = scmp.eq.s32.totalorder %s1969_s6, 9  ;;  %p1943_p7 = scmp.lt.s32.totalorder %s1276_s25, 10 }
  0x29   : > { %s187_s10 = sand.u32 1, %s1276_s25   ;;  %s189_s7 = sand.u32 1, %s1244_s17  }
  0x2a   : > { %p1440_p8 = por %p146_p5, %p145_p4  ;;  %s883_s28 = smul.u32 48, %s189_s7 }
  0x2b   : > { %s884_s23 = smul.u32 6, %s2016_s30  ;;  %p1451_p9 = pnand %p1943_p7, %p1408_p10 }
  0x2c   : > { %s1970_s29 = scalar_select %p1440_p8, 1, 0 }
  0x2d   : > { %s885_s11 = smul.u32 24, %s1272_s24  ;;  %s191_s6 = scalar_lea.vmem [#allocation6], %s883_s28 }
  0x2e   : > { %1971 = sst [smem:[#allocation24_spill]] %s1970_s29  ;;  %s203_s8 = sshll.u32 %s191_s6, 4  ;;  %s1456_s8 = int_to_ptr.vmem [resolvable:$true] %s203_s8 }
  0x2f   : > { %s200_s14 = sadd.s32 %s885_s11, %s884_s23  ;;  %s1973_s1 = sld [smem:[#allocation26_spill]] }
  0x30   : > { %s869_s12 = sshll.u32 %s200_s14, 7  ;;  %s1465_s9 = scalar_lea.sflag [#allocation7], %s187_s10 }
  0x31   : > { %p1034_p0 = pneg %p1451_p9 }
  0x35   : > { %s1462_s30 = scalar_lea.hbm %s1973_s1, %s869_s12  ;;  %s1037_s12 = scalar_lea.hbm %s1973_s1, 6144 }
  0x36   : > { %s1032_s7 = scalar_lea.hbm %s1462_s30, 768  ;;  %p1038_p7 = scmp.lt.u32.totalorder %s1462_s30, %s1973_s1 }
  0x37   : > { %p1033_p13 = scmp.ne.s32.totalorder %s1462_s30, %s1032_s7  ;;  %p1039_p2 = scmp.lt.u32.totalorder %s1037_s12, %s1032_s7 }
  0x38   : > { %p1041_p6 = scmp.lt.u32.totalorder %s1032_s7, %s1462_s30 }
  0x39   : > { %p1035_p4 = pnand %p1034_p0, %p1033_p13  ;;  %p1040_p1 = por %p1039_p2, %p1038_p7 }
  0x3b   : > { %p1036_p5 = pneg %p1035_p4  ;;  %p1042_p12 = por %p1041_p6, %p1040_p1 }
  0x3d   : > { %p1043_p10 = pnand %p1042_p12, %p1036_p5 }
  0x3f   : > { %1046 = shalt.err (!%p1043_p10)
}
  0x40   : > { %s1047_s29 = scalar_lea.vmem %s1456_s8, 768  ;;  %s1278_s11 = smov [#allocation6]  }
  0x41   : > { %p1048_p13 = scmp.ne.s32.totalorder %s1456_s8, %s1047_s29  ;;  %s1052_s10 = sshll.u32 %s1278_s11, 4  ;;  %s1053_s10 = int_to_ptr.vmem [resolvable:$false] %s1052_s10 }
  0x42   : > { %s1054_s6 = scalar_lea.vmem %s1053_s10, 1536  ;;  %p1055_p3 = scmp.lt.s32.totalorder %s1456_s8, %s1053_s10 }
  0x43   : > { %p1050_p4 = pnand %p1048_p13, %p1034_p0  ;;  %p1056_p2 = scmp.lt.s32.totalorder %s1054_s6, %s1047_s29 }
  0x45   : > { %p1051_p8 = pneg %p1050_p4  ;;  %p1057_p7 = por %p1056_p2, %p1055_p3 }
  0x47   : > { %p1058_p1 = pnand %p1057_p7, %p1051_p8 }
  0x49   : > { %1061 = shalt.err (!%p1058_p1)
}
  0x4a   : > { %s1947_s7 = smov 128   ;;  %s1949_s14 = smov 8  }
  0x4b   : > { %905 = dma.hbm_to_vmem [thread:$0]  (!%p1451_p9), %s1462_s30, 768, %s1456_s8, %s1465_s9, %s1947_s7, %s1947_s7, %s1949_s14  }
  0x4c   : > { %p1974_p6 = scmp.lt.s32.totalorder %s1276_s25, 11  ;;  %p1975_p3 = scmp.ge.s32.totalorder %s1276_s25, 1 }
  0x4d   : > { %s41_s12 = sadd.s32 1, %s1256_s20  ;;  %p1977_p12 = scmp.eq.s32.totalorder %s1396_s5, 0 }
  0x4e   : > { %p1500_p8 = pnand %p1975_p3, %p1974_p6  ;;  %p48_p10 = scmp.ne.s32.totalorder %s1256_s20, %s1252_s19 }
  0x4f   : > { %s1508_s17 = scalar_select %p1977_p12, %s1256_s20, %s41_s12  }
  0x50   : > { %p54_p0 = scmp.ne.s32.totalorder %s1252_s19, %s1248_s18  ;;  %s166_s28 = sand.u32 1, %s1256_s20  }
  0x51   : > { %1978 = sst [smem:[#allocation25_spill]] %s1508_s17  ;;  %s882_s29 = smul.u32 768, %s1272_s24 }
  0x52   : > { %p1979_p5 = scmp.eq.s32.totalorder %s1276_s25, 0  ;;  %p1980_p4 = scmp.eq.s32.totalorder %s1378_s26, 0 }
  0x53   : > { %s1524_s8 = smul.u32 48, %s166_s28  ;;  %s1529_s5 = scalar_lea.hbm %s1932_s0, %s882_s29 }
  0x54   : > { %p50_p13 = por %p1979_p5, %p48_p10  ;;  %p1520_p2 = por %p1980_p4, %p54_p0 }
  0x55   : > { %p1982_p9 = scmp.lt.s32.totalorder %s1276_s25, 10  ;;  %s170_s10 = scalar_lea.vmem [#allocation3], %s1524_s8 }
  0x56   : > { %s1981_s15 = scalar_select %p1520_p2, 1, 0 }
  0x57   : > { %p1533_p7 = pnand %p1982_p9, %p50_p13  ;;  %s177_s6 = sshll.u32 %s170_s10, 4  ;;  %s1538_s6 = int_to_ptr.vmem [resolvable:$true] %s177_s6 }
  0x58   : > { %s1543_s11 = scalar_lea.hbm %s1934_s2, %s882_s29  ;;  %s1545_s7 = scalar_lea.sflag [#allocation4], %s166_s28 }
  0x59   : > { %s1062_s14 = scalar_lea.hbm %s1529_s5, 768  ;;  %p1064_p6 = pneg %p1533_p7 }
  0x5a   : > { %p1063_p1 = scmp.ne.s32.totalorder %s1529_s5, %s1062_s14  ;;  %s1067_s10 = scalar_lea.hbm %s1932_s0, 1536 }
  0x5b   : > { %p1068_p10 = scmp.lt.u32.totalorder %s1529_s5, %s1932_s0  ;;  %p1069_p0 = scmp.lt.u32.totalorder %s1067_s10, %s1062_s14 }
  0x5c   : > { %p1065_p3 = pnand %p1064_p6, %p1063_p1  ;;  %p1071_p13 = scmp.lt.u32.totalorder %s1062_s14, %s1529_s5 }
  0x5d   : > { %p1070_p5 = por %p1069_p0, %p1068_p10 }
  0x5e   : > { %p1066_p12 = pneg %p1065_p3 }
  0x5f   : > { %p1072_p4 = por %p1071_p13, %p1070_p5 }
  0x61   : > { %p1073_p9 = pnand %p1072_p4, %p1066_p12 }
  0x63   : > { %1076 = shalt.err (!%p1073_p9)
}
  0x64   : > { %s1077_s28 = scalar_lea.vmem %s1538_s6, 768  ;;  %s1281_s1 = smov [#allocation3]  }
  0x65   : > { %p1078_p1 = scmp.ne.s32.totalorder %s1538_s6, %s1077_s28  ;;  %s1082_s24 = sshll.u32 %s1281_s1, 4  ;;  %s1083_s24 = int_to_ptr.vmem [resolvable:$false] %s1082_s24 }
  0x66   : > { %s1084_s20 = scalar_lea.vmem %s1083_s24, 1536  ;;  %p1085_p2 = scmp.lt.s32.totalorder %s1538_s6, %s1083_s24 }
  0x67   : > { %p1080_p3 = pnand %p1078_p1, %p1064_p6  ;;  %p1086_p10 = scmp.lt.s32.totalorder %s1084_s20, %s1077_s28 }
  0x69   : > { %p1081_p11 = pneg %p1080_p3  ;;  %p1087_p0 = por %p1086_p10, %p1085_p2 }
  0x6b   : > { %p1088_p5 = pnand %p1087_p0, %p1081_p11 }
  0x6d   : > { %1091 = shalt.err (!%p1088_p5)
}
  0x6e   : > { %s1984_s14 = smov 8   ;;  %s1985_s17 = smov 128  }
  0x6f   : > { %902 = dma.hbm_to_vmem [thread:$0]  (!%p1533_p7), %s1529_s5, 768, %s1538_s6, %s1545_s7, %s1985_s17, %s1985_s17, %s1984_s14  }
  0x70   : > { %s217_s29 = scalar_lea.vmem [#allocation8], %s1524_s8  ;;  %s1092_s30 = scalar_lea.hbm %s1543_s11, 768 }
  0x71   : > { %s224_s12 = sshll.u32 %s217_s29, 4  ;;  %p1093_p11 = scmp.ne.s32.totalorder %s1543_s11, %s1092_s30  ;;  %s1577_s12 = int_to_ptr.vmem [resolvable:$true] %s224_s12 }
  0x72   : > { %s1097_s1 = scalar_lea.hbm %s1934_s2, 1536  ;;  %p1098_p13 = scmp.lt.u32.totalorder %s1543_s11, %s1934_s2 }
  0x73   : > { %p1095_p2 = pnand %p1093_p11, %p1064_p6  ;;  %p1099_p4 = scmp.lt.u32.totalorder %s1097_s1, %s1092_s30 }
  0x74   : > { %p1101_p1 = scmp.lt.u32.totalorder %s1092_s30, %s1543_s11 }
  0x75   : > { %p1096_p12 = pneg %p1095_p2  ;;  %p1100_p9 = por %p1099_p4, %p1098_p13 }
  0x77   : > { %p1102_p3 = por %p1101_p1, %p1100_p9 }
  0x79   : > { %p1103_p10 = pnand %p1102_p3, %p1096_p12 }
  0x7b   : > { %1106 = shalt.err (!%p1103_p10)
}
  0x7c   : > { %s1107_s7 = scalar_lea.vmem %s1577_s12, 768  ;;  %s1282_s8 = smov [#allocation8]  }
  0x7d   : > { %p1108_p0 = scmp.ne.s32.totalorder %s1577_s12, %s1107_s7  ;;  %s1112_s5 = sshll.u32 %s1282_s8, 4  ;;  %s1113_s5 = int_to_ptr.vmem [resolvable:$false] %s1112_s5 }
  0x7e   : > { %s1114_s6 = scalar_lea.vmem %s1113_s5, 1536  ;;  %p1115_p2 = scmp.lt.s32.totalorder %s1577_s12, %s1113_s5 }
  0x7f   : > { %p1110_p5 = pnand %p1108_p0, %p1064_p6  ;;  %p1116_p13 = scmp.lt.s32.totalorder %s1114_s6, %s1107_s7 }
  0x81   : > { %p1111_p11 = pneg %p1110_p5  ;;  %p1117_p4 = por %p1116_p13, %p1115_p2 }
  0x83   : > { %p1118_p9 = pnand %p1117_p4, %p1111_p11 }
  0x85   : > { %1121 = shalt.err (!%p1118_p9)
}
  0x86   : > { %908 = dma.hbm_to_vmem [thread:$0]  (!%p1533_p7), %s1543_s11, 768, %s1577_s12, %s1465_s9, %s1985_s17, %s1985_s17, %s1984_s14  }
  0x87   : > { %236 = sbr.rel (%p1500_p8) target bundleno = 501 (0x1f5), region = 32  ;;  %s238_s29 = sand.u32 (!%p1500_p8), 1, %s1252_s19  }
  0x88   : > { %s888_s30 = smul.u32 (!%p1500_p8), 48, %s238_s29  ;;  %s239_s10 = scalar_lea.sflag (!%p1500_p8), [#allocation4], %s238_s29 }
  0x89   : > { %p1986_p6 = scmp.ne.s32.totalorder (!%p1500_p8), %s1981_s15, 0 }
  0x8a   : > { %s1609_s28 = scalar_lea.vmem (!%p1500_p8), [#allocation3], %s888_s30 }
  0x8e   : > { %1207 = dma.done.wait (%p1986_p6), %s239_s10, 768  }
  0x8f   : > { %1209 = vsyncadd (%p1986_p6), %s239_s10, 4294966528  ;;  %s247_s18 = sand.u32 1, %s1378_s26   ;;  %s249_s9 = sand.u32 1, %s1240_s16  }
  0x90   : > { %s889_s11 = smul.u32 48, %s249_s9  ;;  %s248_s23 = scalar_lea.sflag [#allocation7], %s247_s18 }
  0x91   : > { %p1987_p8 = scmp.ne.s32.totalorder %s1966_s4, 0 }
  0x92   : > { %s1617_s14 = scalar_lea.vmem [#allocation6], %s889_s11 }
  0x93   : > { %1211 = dma.done.wait (%p1987_p8), %s248_s23, 768  }
  0x94   : > { %1213 = vsyncadd (%p1987_p8), %s248_s23, 4294966528  ;;  %s260_s17 = scalar_lea.vmem [#allocation8], %s888_s30 }
  0x95   : > { %1215 = dma.done.wait (%p1986_p6), %s248_s23, 768  }
  0x96   : > { %1217 = vsyncadd (%p1986_p6), %s248_s23, 4294966528  ;;  %s290_s12 = sand.u32 1, %s1228_s13   ;;  %v295_v0 = vlaneseq  ;;  %v1283_v6 = vmov 0.0   ;;  %v1635_v10 = vld [vmem:[%s260_s17] sm:$0xff]  ;;  %v1637_v11 = vld [vmem:[%s260_s17 + $0x8] sm:$0xff]  ;;  %p876_p7 = scmp.ne.s32.totalorder %s1260_s21, 0 }
  0x97   : > { %v1639_v12 = vld [vmem:[%s260_s17 + $0x10] sm:$0xff]  ;;  %v1641_v13 = vld [vmem:[%s260_s17 + $0x18] sm:$0xff]  ;;  %v1643_v14 = vld [vmem:[%s260_s17 + $0x20] sm:$0xff]  ;;  %s1655_s26 = scalar_lea.vmem [#allocation9], %s290_s12  ;;  %s1284_s4 = smov (!%p876_p7), 1   ;;  %v427_v25 = vrot.slane (!%p876_p7), %v1635_v10, 7 }
  0x98   : > { %v296_v1 = vand.u32 127, %v295_v0  ;;  %v1628_v2 = vshrl.u32 %v295_v0, 7  ;;  %v1645_v15 = vld [vmem:[%s260_s17 + $0x28] sm:$0xff]  ;;  %v1659_v19 = vld [vmem:[%s1609_s28] sm:$0xff] (!%p876_p7)  ;;  %409 = vrot.lane.b32.xlu0 (!%p876_p7), %v1635_v10, %s1284_s4  ;;  %v1669_v21 = vld [vmem:[%s1609_s28 + $0x10] sm:$0xff] (!%p876_p7)  ;;  %v428_v31 = vrot.slane (!%p876_p7), %v1637_v11, 7 }
  0x99   : > { %408 = sbr.rel (%p876_p7) target bundleno = 317 (0x13d), region = 48  ;;  %488 = vrot.lane.b32.xlu1 (!%p876_p7), %v1659_v19, %s1284_s4  ;;  %v1664_v20 = vld [vmem:[%s1609_s28 + $0x8] sm:$0xff] (!%p876_p7)  ;;  %v1674_v22 = vld [vmem:[%s1609_s28 + $0x18] sm:$0xff] (!%p876_p7)  ;;  %v1679_v23 = vld [vmem:[%s1609_s28 + $0x20] sm:$0xff] (!%p876_p7)  ;;  %v432_v26 = vrot.slane (!%p876_p7), %v1645_v15, 7  ;;  %v506_v27 = vrot.slane (!%p876_p7), %v1659_v19, 7  ;;  %v566_v36 = vsub.f32 (!%p876_p7), %v1659_v19, %v1635_v10  ;;  %v568_v57 = vsub.f32 (!%p876_p7), %v1669_v21, %v1639_v12 }
  0x9a   : > { %vm297_vm0 = vcmp.gt.s32.totalorder %v296_v1, 0  ;;  %vm298_vm1 = vcmp.lt.s32.totalorder %v296_v1, 16  ;;  %v305_v3 = vadd.s32 16, %v1628_v2  ;;  %v307_v4 = vadd.s32 32, %v1628_v2  ;;  %v1684_v24 = vld [vmem:[%s1609_s28 + $0x28] sm:$0xff] (!%p876_p7) }
  0x9b   : > { %vm299_vm2 = vmand %vm297_vm0, %vm298_vm1  ;;  %v313_v5 = vand.u32 15, %v1628_v2  ;;  %vm433_vm6 = vcmp.lt.s32.totalorder (!%p876_p7), %v1628_v2, 1  ;;  %v507_v28 = vrot.slane (!%p876_p7), %v1664_v20, 7  ;;  %v511_v29 = vrot.slane (!%p876_p7), %v1684_v24, 7 }
  0x9c   : > { %v1633_v7 = vsel %vm299_vm2, 1.0, %v1283_v6  ;;  %v327_v8 = vand.u32 15, %v305_v3  ;;  %v341_v9 = vand.u32 15, %v307_v4  ;;  %411 = vrot.lane.b32.xlu0 (!%p876_p7), %v1637_v11, %s1284_s4  ;;  %v439_v30 = vsel (!%p876_p7), %vm433_vm6, %v432_v26, %v427_v25 }
  0x9d   : > { %vm381_vm3 = vcmp.ne.s32.totalorder %v313_v5, 0  ;;  %490 = vrot.lane.b32.xlu1 (!%p876_p7), %v1664_v20, %s1284_s4  ;;  %v508_v32 = vrot.slane (!%p876_p7), %v1669_v21, 7  ;;  %v517_v33 = vsel (!%p876_p7), %vm433_vm6, %v511_v29, %v506_v27  ;;  %v516_v35 = vsel (!%p876_p7), %vm433_vm6, %v506_v27, %v507_v28 }
  0x9e   : > { %vm383_vm4 = vcmp.ne.s32.totalorder %v327_v8, 0  ;;  %vm385_vm5 = vcmp.ne.s32.totalorder %v341_v9, 0  ;;  %v1647_v16 = vsel %vm381_vm3, 1.0, %v1283_v6  ;;  %v438_v37 = vsel (!%p876_p7), %vm433_vm6, %v427_v25, %v428_v31 }
  0x9f   : > { %v1649_v17 = vsel %vm383_vm4, 1.0, %v1283_v6  ;;  %v1651_v18 = vsel %vm385_vm5, 1.0, %v1283_v6  ;;  %v440_v34 = vmul.f32 (!%p876_p7), %v1647_v16, %v439_v30  ;;  %v429_v38 = vrot.slane (!%p876_p7), %v1639_v12, 7 }
  0xa0   : > { %413 = vrot.lane.b32.xlu0 %v1639_v12, %s1284_s4  ;;  %v518_v39 = vmul.f32 %v1647_v16, %v517_v33  ;;  %v537_v40 = vsub.f32 %v516_v35, %v1664_v20  ;;  %v567_v41 = vsub.f32 %v1664_v20, %v1637_v11  ;;  %v515_v42 = vsel %vm433_vm6, %v507_v28, %v508_v32 }
  0xa1   : > { %492 = vrot.lane.b32.xlu1 %v1669_v21, %s1284_s4  ;;  %v509_v43 = vrot.slane %v1674_v22, 7  ;;  %v458_v44 = vsub.f32 %v440_v34, %v1635_v10  ;;  %v510_v45 = vrot.slane %v1679_v23, 7  ;;  %v1721_v47 = vmul.f32 %v566_v36, %v566_v36 }
  0xa2   : > { %v459_v49 = vsub.f32 %v438_v37, %v1637_v11  ;;  %v520_v52 = vmul.f32 %v1649_v17, %v515_v42  ;;  %v437_v53 = vsel %vm433_vm6, %v428_v31, %v429_v38  ;;  %v536_v54 = vsub.f32 %v518_v39, %v1659_v19 }
  0xa3   : > { %v543_v55 = vand.u32 2147483647, %v537_v40  ;;  %v1730_v56 = vmul.f32 %v567_v41, %v567_v41  ;;  %v464_v58 = vand.u32 2147483647, %v458_v44  ;;  %v514_v60 = vsel %vm433_vm6, %v508_v32, %v509_v43 }
  0xa4   : > { %415 = vrot.lane.b32.xlu0 %v1641_v13, %s1284_s4  ;;  %v430_v61 = vrot.slane %v1641_v13, 7  ;;  %v465_v0 = vand.u32 2147483647, %v459_v49  ;;  %v442_v3 = vmul.f32 %v1649_v17, %v437_v53  ;;  %v431_v4 = vrot.slane %v1643_v14, 7 }
  0xa5   : > { %494 = vrot.lane.b32.xlu1 %v1674_v22, %s1284_s4  ;;  %v538_v9 = vsub.f32 %v520_v52, %v1669_v21  ;;  %v542_v25 = vand.u32 2147483647, %v536_v54  ;;  %v1744_v27 = vmul.f32 %v568_v57, %v568_v57  ;;  %v539_v28 = vsub.f32 %v514_v60, %v1674_v22 }
  0xa6   : > { %v436_v33 = vsel %vm433_vm6, %v429_v38, %v430_v61  ;;  %v460_v36 = vsub.f32 %v442_v3, %v1639_v12  ;;  %v569_v39 = vsub.f32 %v1674_v22, %v1641_v13  ;;  %v435_v40 = vsel %vm433_vm6, %v430_v61, %v431_v4 }
  0xa7   : > { %v544_v44 = vand.u32 2147483647, %v538_v9  ;;  %v444_v52 = vmul.f32 %v1651_v18, %v435_v40  ;;  %v434_v9 = vsel %vm433_vm6, %v431_v4, %v432_v26 }
  0xa8   : > { %417 = vrot.lane.b32.xlu0 %v1643_v14, %s1284_s4  ;;  %v466_v54 = vand.u32 2147483647, %v460_v36  ;;  %v463_v26 = vsub.f32 %v434_v9, %v1645_v15 }
  0xa9   : > { %496 = vrot.lane.b32.xlu1 %v1679_v23, %s1284_s4 }
  0xac   : > { %419 = vrot.lane.b32.xlu0 %v1645_v15, %s1284_s4 }
  0xad   : > { %498 = vrot.lane.b32.xlu1 %v1684_v24, %s1284_s4 }
 0x10a   : > { %v410_v48 = vpop.permute.xlu0 %409 }
 0x10b   : > { %v489_v46 = vpop.permute.xlu1 %488  ;;  %v421_v51 = vmul.f32 %v1633_v7, %v410_v48  ;;  %v461_v48 = vsub.f32 %v436_v33, %v1641_v13 }
 0x10c   : > { %v500_v50 = vmul.f32 %v1633_v7, %v489_v46  ;;  %v545_v46 = vand.u32 2147483647, %v539_v28 }
 0x10d   : > { %v446_v59 = vsub.f32 %v421_v51, %v1635_v10 }
 0x10e   : > { %v524_v62 = vsub.f32 %v500_v50, %v1659_v19  ;;  %v412_v1 = vpop.permute.xlu0 %411  ;;  %v513_v19 = vsel %vm433_vm6, %v509_v43, %v510_v45 }
 0x10f   : > { %v491_v63 = vpop.permute.xlu1 %490  ;;  %v452_v5 = vand.u32 2147483647, %v446_v59  ;;  %v422_v8 = vmul.f32 %v1633_v7, %v412_v1  ;;  %v522_v43 = vmul.f32 %v1651_v18, %v513_v19  ;;  %v1767_v59 = vmul.f32 %v569_v39, %v569_v39 }
 0x110   : > { %v501_v6 = vmul.f32 %v1633_v7, %v491_v63  ;;  %v530_v34 = vand.u32 2147483647, %v524_v62  ;;  %v467_v1 = vand.u32 2147483647, %v461_v48 }
 0x111   : > { %v470_v30 = vadd.f32 %v464_v58, %v452_v5  ;;  %v447_v32 = vsub.f32 %v422_v8, %v1637_v11  ;;  %v540_v63 = vsub.f32 %v522_v43, %v1679_v23  ;;  %v462_v8 = vsub.f32 %v444_v52, %v1643_v14 }
 0x112   : > { %v525_v31 = vsub.f32 %v501_v6, %v1664_v20  ;;  %v414_v37 = vpop.permute.xlu0 %413  ;;  %v548_v53 = vadd.f32 %v542_v25, %v530_v34  ;;  %v570_v43 = vsub.f32 %v1679_v23, %v1643_v14 }
 0x113   : > { %v493_v35 = vpop.permute.xlu1 %492  ;;  %476 = vst [vmem:[#allocation2] sm:$0xff] %v470_v30  ;;  %v453_v42 = vand.u32 2147483647, %v447_v32  ;;  %v423_v38 = vmul.f32 %v1633_v7, %v414_v37  ;;  %v546_v33 = vand.u32 2147483647, %v540_v63 }
 0x114   : > { %v531_v41 = vand.u32 2147483647, %v525_v31  ;;  %v502_v20 = vmul.f32 %v1633_v7, %v493_v35  ;;  %v554_v25 = vsub.f32 %v548_v53, %v470_v30  ;;  %v468_v39 = vand.u32 2147483647, %v462_v8 }
 0x115   : > { %v471_v50 = vadd.f32 %v465_v0, %v453_v42  ;;  %v448_v57 = vsub.f32 %v423_v38, %v1639_v12  ;;  %v576_v63 = vmul.f32 %v570_v43, %v570_v43 }
 0x116   : > { %v549_v49 = vadd.f32 %v543_v55, %v531_v41  ;;  %v526_v51 = vsub.f32 %v502_v20, %v1669_v21  ;;  %v416_v60 = vpop.permute.xlu0 %415  ;;  %v512_v21 = vsel %vm433_vm6, %v510_v45, %v511_v29  ;;  %v560_v41 = vand.u32 2147483647, %v554_v25 }
 0x117   : > { %v495_v58 = vpop.permute.xlu1 %494  ;;  %477 = vst [vmem:[#allocation2 + $0x8] sm:$0xff] %v471_v50  ;;  %v454_v0 = vand.u32 2147483647, %v448_v57  ;;  %v424_v3 = vmul.f32 %v1633_v7, %v416_v60  ;;  %v541_v31 = vsub.f32 %v512_v21, %v1684_v24  ;;  %v571_v21 = vsub.f32 %v1684_v24, %v1645_v15 }
 0x118   : > { %v532_v61 = vand.u32 2147483647, %v526_v51  ;;  %v503_v62 = vmul.f32 %v1633_v7, %v495_v58  ;;  %v555_v55 = vsub.f32 %v549_v49, %v471_v50 }
 0x119   : > { %v472_v28 = vadd.f32 %v466_v54, %v454_v0  ;;  %v449_v19 = vsub.f32 %v424_v3, %v1641_v13  ;;  %v547_v53 = vand.u32 2147483647, %v541_v31  ;;  %v469_v54 = vand.u32 2147483647, %v463_v26 }
 0x11a   : > { %v550_v5 = vadd.f32 %v544_v44, %v532_v61  ;;  %v527_v6 = vsub.f32 %v503_v62, %v1674_v22  ;;  %v418_v45 = vpop.permute.xlu0 %417  ;;  %v561_v35 = vand.u32 2147483647, %v555_v55  ;;  %v578_v61 = vadd.f32 %v1721_v47, %v560_v41 }
 0x11b   : > { %v497_v29 = vpop.permute.xlu1 %496  ;;  %v425_v22 = vmul.f32 %v1633_v7, %v418_v45  ;;  %478 = vst [vmem:[#allocation2 + $0x10] sm:$0xff] %v472_v28  ;;  %v455_v37 = vand.u32 2147483647, %v449_v19 }
 0x11c   : > { %v533_v32 = vand.u32 2147483647, %v527_v6  ;;  %v504_v34 = vmul.f32 %v1633_v7, %v497_v29  ;;  %v556_v36 = vsub.f32 %v550_v5, %v472_v28  ;;  %v577_v28 = vmul.f32 %v571_v21, %v571_v21 }
 0x11d   : > { %v450_v40 = vsub.f32 %v425_v22, %v1643_v14  ;;  %v473_v20 = vadd.f32 %v467_v1, %v455_v37 }
 0x11e   : > { %v551_v4 = vadd.f32 %v545_v46, %v533_v32  ;;  %v528_v30 = vsub.f32 %v504_v34, %v1679_v23  ;;  %v562_v42 = vand.u32 2147483647, %v556_v36  ;;  %v420_v38 = vpop.permute.xlu0 %419  ;;  %v579_v46 = vadd.f32 %v1730_v56, %v561_v35 }
 0x11f   : > { %v499_v44 = vpop.permute.xlu1 %498  ;;  %v456_v49 = vand.u32 2147483647, %v450_v40  ;;  %v426_v51 = vmul.f32 %v1633_v7, %v420_v38  ;;  %479 = vst [vmem:[#allocation2 + $0x18] sm:$0xff] %v473_v20 }
 0x120   : > { %v534_v48 = vand.u32 2147483647, %v528_v30  ;;  %v505_v50 = vmul.f32 %v1633_v7, %v499_v44  ;;  %v557_v52 = vsub.f32 %v551_v4, %v473_v20  ;;  %v580_v55 = vadd.f32 %v1744_v27, %v562_v42 }
 0x121   : > { %v474_v58 = vadd.f32 %v468_v39, %v456_v49  ;;  %v451_v23 = vsub.f32 %v426_v51, %v1645_v15  ;;  %v584_v3 = vadd.f32 %v579_v46, %v578_v61 }
 0x122   : > { %v552_v57 = vadd.f32 %v546_v33, %v534_v48  ;;  %v529_v60 = vsub.f32 %v505_v50, %v1684_v24  ;;  %v563_v62 = vand.u32 2147483647, %v557_v52 }
 0x123   : > { %480 = vst [vmem:[#allocation2 + $0x20] sm:$0xff] %v474_v58  ;;  %v457_v1 = vand.u32 2147483647, %v451_v23  ;;  %v585_v25 = vadd.f32 %v584_v3, %v580_v55 }
 0x124   : > { %v558_v56 = vsub.f32 %v552_v57, %v474_v58  ;;  %v535_v0 = vand.u32 2147483647, %v529_v60  ;;  %v581_v5 = vadd.f32 %v1767_v59, %v563_v62 }
 0x125   : > { %v475_v9 = vadd.f32 %v469_v54, %v457_v1 }
 0x126   : > { %v564_v6 = vand.u32 2147483647, %v558_v56  ;;  %v553_v8 = vadd.f32 %v547_v53, %v535_v0  ;;  %v586_v29 = vadd.f32 %v585_v25, %v581_v5 }
 0x127   : > { %481 = vst [vmem:[#allocation2 + $0x28] sm:$0xff] %v475_v9 }
 0x128   : > { %v582_v47 = vadd.f32 %v576_v63, %v564_v6  ;;  %v559_v19 = vsub.f32 %v553_v8, %v475_v9 }
 0x12a   : > { %v565_v24 = vand.u32 2147483647, %v559_v19  ;;  %v587_v45 = vadd.f32 %v586_v29, %v582_v47 }
 0x12c   : > { %v583_v27 = vadd.f32 %v577_v28, %v565_v24 }
 0x12e   : > { %v588_v31 = vadd.f32 %v587_v45, %v583_v27 }
 0x130   : > { %v589_v32 = vrot.slane %v588_v31, 4 }
 0x132   : > { %v590_v33 = vadd.f32 %v589_v32, %v588_v31 }
 0x134   : > { %v591_v34 = vrot.slane %v590_v33, 2 }
 0x136   : > { %v592_v22 = vadd.f32 %v591_v34, %v590_v33 }
 0x138   : > { %v593_v35 = vrot.slane %v592_v22, 1 }
 0x13a   : > { %v594_v59 = vadd.f32 %v593_v35, %v592_v22 }
 0x13c   : > { %595 = vst [vmem:[%s1655_s26] sm:$0x1] %v594_v59 }
 0x13d PF: > { %p877_p12 = scmp.eq.s32.totalorder %s1260_s21, 0 }
 0x13e   : > { %v600_v36 = vld [vmem:[%s1617_s14] sm:$0xff] (!%p877_p12)  ;;  %v602_v37 = vld [vmem:[%s1617_s14 + $0x10] sm:$0xff] (!%p877_p12)  ;;  %s1285_s15 = smov (!%p877_p12), 1   ;;  %v601_v26 = vld [vmem:[%s1617_s14 + $0x8] sm:$0xff] (!%p877_p12)  ;;  %vm636_vm7 = vcmp.lt.s32.totalorder (!%p877_p12), %v1628_v2, 1 }
 0x13f   : > { %599 = sbr.rel (%p877_p12) target bundleno = 475 (0x1db), region = 52  ;;  %612 = vrot.lane.b32.xlu0 (!%p877_p12), %v600_v36, %s1285_s15  ;;  %616 = vrot.lane.b32.xlu1 (!%p877_p12), %v602_v37, %s1285_s15  ;;  %v603_v4 = vld [vmem:[%s1617_s14 + $0x18] sm:$0xff] (!%p877_p12)  ;;  %v1810_v30 = vld [vmem:[%s1617_s14 + $0x20] sm:$0xff] (!%p877_p12)  ;;  %v630_v40 = vrot.slane (!%p877_p12), %v600_v36, 7  ;;  %v632_v41 = vrot.slane (!%p877_p12), %v602_v37, 7  ;;  %v631_v42 = vrot.slane (!%p877_p12), %v601_v26, 7  ;;  %v691_v25 = vsub.f32 (!%p877_p12), %v600_v36, %v1635_v10 }
 0x140   : > { %v1813_v39 = vld [vmem:[%s1617_s14 + $0x28] sm:$0xff] (!%p877_p12)  ;;  %v633_v38 = vrot.slane (!%p877_p12), %v603_v4, 7  ;;  %v634_v50 = vrot.slane (!%p877_p12), %v1810_v30, 7  ;;  %v606_v9 = vld [vmem:[#allocation2] sm:$0xff] (!%p877_p12)  ;;  %v693_v47 = vsub.f32 (!%p877_p12), %v602_v37, %v1639_v12  ;;  %v608_v27 = vld [vmem:[#allocation2 + $0x10] sm:$0xff] (!%p877_p12)  ;;  %v692_v22 = vsub.f32 (!%p877_p12), %v601_v26, %v1637_v11 }
 0x141   : > { %v635_v20 = vrot.slane (!%p877_p12), %v1813_v39, 7  ;;  %v640_v44 = vsel (!%p877_p12), %vm636_vm7, %v631_v42, %v632_v41  ;;  %v641_v52 = vsel (!%p877_p12), %vm636_vm7, %v630_v40, %v631_v42  ;;  %v697_v59 = vmul.f32 (!%p877_p12), %v691_v25, %v691_v25  ;;  %v607_v12 = vld [vmem:[#allocation2 + $0x8] sm:$0xff] (!%p877_p12) }
 0x142   : > { %v645_v49 = vmul.f32 (!%p877_p12), %v1649_v17, %v640_v44  ;;  %v639_v53 = vsel (!%p877_p12), %vm636_vm7, %v632_v41, %v633_v38  ;;  %v662_v17 = vsub.f32 (!%p877_p12), %v641_v52, %v601_v26 }
 0x143   : > { %614 = vrot.lane.b32.xlu0 (!%p877_p12), %v601_v26, %s1285_s15  ;;  %618 = vrot.lane.b32.xlu1 (!%p877_p12), %v603_v4, %s1285_s15  ;;  %v642_v43 = vsel (!%p877_p12), %vm636_vm7, %v635_v20, %v630_v40  ;;  %v664_v23 = vsub.f32 (!%p877_p12), %v639_v53, %v603_v4  ;;  %v637_v1 = vsel (!%p877_p12), %vm636_vm7, %v634_v50, %v635_v20  ;;  %v611_v53 = vld [vmem:[#allocation2 + $0x28] sm:$0xff] (!%p877_p12) }
 0x144   : > { %v643_v48 = vmul.f32 (!%p877_p12), %v1647_v16, %v642_v43  ;;  %v663_v46 = vsub.f32 (!%p877_p12), %v645_v49, %v602_v37  ;;  %v638_v16 = vsel (!%p877_p12), %vm636_vm7, %v633_v38, %v634_v50  ;;  %v668_v28 = vand.u32 (!%p877_p12), 2147483647, %v662_v17 }
 0x145   : > { %v647_v0 = vmul.f32 (!%p877_p12), %v1651_v18, %v638_v16  ;;  %v670_v19 = vand.u32 (!%p877_p12), 2147483647, %v664_v23  ;;  %v666_v32 = vsub.f32 (!%p877_p12), %v637_v1, %v1813_v39  ;;  %v699_v20 = vmul.f32 (!%p877_p12), %v693_v47, %v693_v47 }
 0x146   : > { %v661_v51 = vsub.f32 %v643_v48, %v600_v36  ;;  %v669_v21 = vand.u32 2147483647, %v663_v46  ;;  %v698_v50 = vmul.f32 %v692_v22, %v692_v22  ;;  %v696_v16 = vsub.f32 %v1813_v39, %v1645_v15 }
 0x147   : > { %620 = vrot.lane.b32.xlu0 %v1810_v30, %s1285_s15  ;;  %622 = vrot.lane.b32.xlu1 %v1813_v39, %s1285_s15  ;;  %v665_v2 = vsub.f32 %v647_v0, %v1810_v30  ;;  %v672_v49 = vand.u32 2147483647, %v666_v32 }
 0x148   : > { %v667_v62 = vand.u32 2147483647, %v661_v51 }
 0x149   : > { %v671_v38 = vand.u32 2147483647, %v665_v2 }
 0x1b1   : > { %v613_v54 = vpop.permute.xlu0 %612  ;;  %v617_v57 = vpop.permute.xlu1 %616 }
 0x1b2   : > { %v624_v58 = vmul.f32 %v1633_v7, %v613_v54  ;;  %v626_v60 = vmul.f32 %v1633_v7, %v617_v57 }
 0x1b4   : > { %v649_v61 = vsub.f32 %v624_v58, %v600_v36  ;;  %v651_v63 = vsub.f32 %v626_v60, %v602_v37  ;;  %v609_v36 = vld [vmem:[#allocation2 + $0x18] sm:$0xff]  ;;  %v694_v37 = vsub.f32 %v603_v4, %v1641_v13  ;;  %v610_v13 = vld [vmem:[#allocation2 + $0x20] sm:$0xff] }
 0x1b5   : > { %v615_v55 = vpop.permute.xlu0 %614  ;;  %v619_v56 = vpop.permute.xlu1 %618 }
 0x1b6   : > { %v655_v3 = vand.u32 2147483647, %v649_v61  ;;  %v657_v5 = vand.u32 2147483647, %v651_v63  ;;  %v625_v6 = vmul.f32 %v1633_v7, %v615_v55  ;;  %v627_v8 = vmul.f32 %v1633_v7, %v619_v56 }
 0x1b7   : > { %v700_v52 = vmul.f32 %v694_v37, %v694_v37 }
 0x1b8   : > { %v673_v29 = vadd.f32 %v667_v62, %v655_v3  ;;  %v675_v24 = vadd.f32 %v669_v21, %v657_v5  ;;  %v650_v45 = vsub.f32 %v625_v6, %v601_v26  ;;  %v652_v18 = vsub.f32 %v627_v8, %v603_v4 }
 0x1b9   : > { %v621_v31 = vpop.permute.xlu0 %620  ;;  %v623_v33 = vpop.permute.xlu1 %622  ;;  %v695_v4 = vsub.f32 %v1810_v30, %v1643_v14  ;;  %v702_v14 = vmul.f32 %v696_v16, %v696_v16 }
 0x1ba   : > { %v679_v34 = vsub.f32 %v673_v29, %v606_v9  ;;  %v656_v35 = vand.u32 2147483647, %v650_v45  ;;  %v658_v10 = vand.u32 2147483647, %v652_v18  ;;  %v628_v40 = vmul.f32 %v1633_v7, %v621_v31 }
 0x1bb   : > { %v629_v41 = vmul.f32 %v1633_v7, %v623_v33  ;;  %v681_v42 = vsub.f32 %v675_v24, %v608_v27  ;;  %v701_v63 = vmul.f32 %v695_v4, %v695_v4 }
 0x1bc   : > { %v674_v43 = vadd.f32 %v668_v28, %v656_v35  ;;  %v676_v44 = vadd.f32 %v670_v19, %v658_v10  ;;  %v653_v48 = vsub.f32 %v628_v40, %v1810_v30  ;;  %v685_v26 = vand.u32 2147483647, %v679_v34 }
 0x1bd   : > { %v654_v11 = vsub.f32 %v629_v41, %v1813_v39  ;;  %v687_v57 = vand.u32 2147483647, %v681_v42 }
 0x1be   : > { %v680_v51 = vsub.f32 %v674_v43, %v607_v12  ;;  %v682_v46 = vsub.f32 %v676_v44, %v609_v36  ;;  %v659_v7 = vand.u32 2147483647, %v653_v48  ;;  %v703_v61 = vadd.f32 %v697_v59, %v685_v26 }
 0x1bf   : > { %v660_v54 = vand.u32 2147483647, %v654_v11  ;;  %v705_v56 = vadd.f32 %v699_v20, %v687_v57 }
 0x1c0   : > { %v686_v58 = vand.u32 2147483647, %v680_v51  ;;  %v688_v60 = vand.u32 2147483647, %v682_v46  ;;  %v677_v17 = vadd.f32 %v671_v38, %v659_v7 }
 0x1c1   : > { %v678_v23 = vadd.f32 %v672_v49, %v660_v54 }
 0x1c2   : > { %v704_v62 = vadd.f32 %v698_v50, %v686_v58  ;;  %v683_v21 = vsub.f32 %v677_v17, %v610_v13  ;;  %v706_v1 = vadd.f32 %v700_v52, %v688_v60 }
 0x1c3   : > { %v684_v55 = vsub.f32 %v678_v23, %v611_v53 }
 0x1c4   : > { %v709_v0 = vadd.f32 %v704_v62, %v703_v61  ;;  %v689_v30 = vand.u32 2147483647, %v683_v21 }
 0x1c5   : > { %v690_v3 = vand.u32 2147483647, %v684_v55 }
 0x1c6   : > { %v710_v5 = vadd.f32 %v709_v0, %v705_v56  ;;  %v707_v6 = vadd.f32 %v701_v63, %v689_v30 }
 0x1c7   : > { %v708_v9 = vadd.f32 %v702_v14, %v690_v3 }
 0x1c8   : > { %v711_v8 = vadd.f32 %v710_v5, %v706_v1 }
 0x1ca   : > { %v712_v25 = vadd.f32 %v711_v8, %v707_v6 }
 0x1cc   : > { %v713_v15 = vadd.f32 %v712_v25, %v708_v9 }
 0x1ce   : > { %v714_v39 = vrot.slane %v713_v15, 4 }
 0x1d0   : > { %v715_v47 = vadd.f32 %v714_v39, %v713_v15 }
 0x1d2   : > { %v716_v28 = vrot.slane %v715_v47, 2 }
 0x1d4   : > { %v717_v19 = vadd.f32 %v716_v28, %v715_v47 }
 0x1d6   : > { %v718_v29 = vrot.slane %v717_v19, 1 }
 0x1d8   : > { %v719_v24 = vadd.f32 %v718_v29, %v717_v19 }
 0x1da   : > { %720 = vst [vmem:[%s1655_s26] sm:$0x1] %v719_v24 }
 0x1db PF: > { %s890_s1 = smul.u32 5, %s1264_s22  ;;  %s736_s24 = sshll.u32 %s1655_s26, 4  ;;  %s1857_s24 = int_to_ptr.vmem [resolvable:$true] %s736_s24 }
 0x1dc   : > { %s722_s29 = scalar_lea.sflag [#allocation5], %s290_s12  ;;  %s1122_s30 = scalar_lea.vmem %s1857_s24, 16 }
 0x1dd   : > { %s732_s20 = sadd.s32 %s1260_s21, %s890_s1  ;;  %p1123_p1 = scmp.ne.s32.totalorder %s1857_s24, %s1122_s30 }
 0x1de   : > { %s878_s7 = sshll.u32 %s732_s20, 4  ;;  %p1988_p3 = scmp.ne.s32.totalorder %s1968_s27, 0 }
 0x1df   : > { %s734_s6 = scalar_lea.hbm %s1935_s3, %s878_s7  ;;  %s1286_s22 = smov [#allocation9]  }
 0x1e0   : > { %p1124_p10 = pnand %p1123_p1, %p1988_p3  ;;  %s1126_s10 = sshll.u32 %s1286_s22, 4  ;;  %s1127_s10 = int_to_ptr.vmem [resolvable:$false] %s1126_s10 }
 0x1e1   : > { %s1128_s21 = scalar_lea.vmem %s1127_s10, 32  ;;  %p1129_p5 = scmp.lt.s32.totalorder %s1857_s24, %s1127_s10 }
 0x1e2   : > { %p1125_p0 = pneg %p1124_p10  ;;  %p1130_p11 = scmp.lt.s32.totalorder %s1128_s21, %s1122_s30 }
 0x1e4   : > { %p1131_p2 = por %p1130_p11, %p1129_p5 }
 0x1e6   : > { %p1132_p13 = pnand %p1131_p2, %p1125_p0 }
 0x1e8   : > { %1135 = shalt.err (!%p1132_p13)
}
 0x1e9   : > { %s1136_s28 = scalar_lea.hbm %s734_s6, 16  ;;  %s1140_s11 = scalar_lea.hbm %s1935_s3, 160 }
 0x1ea   : > { %p1137_p4 = scmp.ne.s32.totalorder %s734_s6, %s1136_s28  ;;  %p1141_p8 = scmp.lt.u32.totalorder %s734_s6, %s1935_s3 }
 0x1eb   : > { %p1142_p7 = scmp.lt.u32.totalorder %s1140_s11, %s1136_s28  ;;  %p1144_p1 = scmp.lt.u32.totalorder %s1136_s28, %s734_s6 }
 0x1ec   : > { %p1138_p9 = pnand %p1137_p4, %p1988_p3 }
 0x1ed   : > { %p1143_p12 = por %p1142_p7, %p1141_p8 }
 0x1ee   : > { %p1139_p6 = pneg %p1138_p9 }
 0x1ef   : > { %p1145_p10 = por %p1144_p1, %p1143_p12 }
 0x1f1   : > { %p1146_p0 = pnand %p1145_p10, %p1139_p6 }
 0x1f3   : > { %1149 = shalt.err (!%p1146_p0)
}
 0x1f4   : > { %897 = dma.vmem_to_hbm [thread:$0]  (%p1988_p3), %s1857_s24, 16, %s734_s6, %s722_s29  }
 0x1f5 PF: > { %s1989_s17 = sld [smem:[#allocation14_spill]]  ;;  %s1990_s12 = sld [smem:[#allocation24_spill]] }
 0x1f6   : > { %p914_p5 = scmp.ge.s32.totalorder %s1276_s25, 2 }
 0x1fb   : > { %s748_s26 = sand.u32 1, %s1989_s17   ;;  %p1991_p11 = scmp.ne.s32.totalorder %s1990_s12, 0 }
 0x1fc   : > { %s749_s4 = scalar_lea.sflag [#allocation5], %s748_s26 }
 0x1fd   : > { %p910_p2 = pnand %p914_p5, %p1991_p11 }
 0x1ff   : > { %1219 = dma.done.wait (!%p910_p2), %s749_s4, 16  }
 0x200   : > { %1221 = vsyncadd (!%p910_p2), %s749_s4, 4294967280  ;;  %s22_s25 = sadd.s32 1, %s1276_s25   ;;  %s1993_s27 = sld [smem:[#allocation15_spill]] }
 0x201   : > { %p1885_p13 = scmp.ge.s32.totalorder %s22_s25, 12   ;;  %s1994_s14 = sld [smem:[#allocation23_spill]] }
 0x202   : > { %s1995_s1 = sld [smem:[#allocation16_spill]]  ;;  %s1996_s17 = sld [smem:[#allocation22_spill]] }
 0x203   : > { %s1997_s24 = sld [smem:[#allocation17_spill]]  ;;  %s1998_s20 = sld [smem:[#allocation25_spill]] }
 0x204   : > { %s1999_s21 = sld [smem:[#allocation18_spill]]  ;;  %s2000_s22 = sld [smem:[#allocation19_spill]] }
 0x205   : > { %s2001_s23 = sld [smem:[#allocation20_spill]]  ;;  %s2002_s7 = sld [smem:[#allocation21_spill]] }
 0x206   : > { %s2004_s12 = smov %s1228_s13  ;;  %s2005_s13 = smov %s1993_s27 }
 0x207   : > { %s2006_s15 = smov %s1240_s16  ;;  %s2008_s18 = smov %s1252_s19 }
 0x208   : > { %s2007_s16 = smov %s1995_s1  ;;  %21 = sbr.rel (!%p1885_p13) target bundleno = 14 (0xe), region = 109 }
 0x209   : > { %s2009_s19 = smov %s1997_s24 }
 0x20b   : > { %s2010_s24 = smov %s2002_s7 }
 0x20f   :  { %753 = vsyncpa [#allocation4], 1 }
 0x210   :  { %755 = vsyncpa [#allocation4 + $0x1], 1 }
 0x211   :  { %756 = vsyncpa [#allocation7], 1 }
 0x212   :  { %758 = vsyncpa [#allocation7 + $0x1], 1 }
 0x213   :  { %759 = vsyncpa [#allocation5], 1 }
 0x214   :  { %761 = vsyncpa [#allocation5 + $0x1], 1 }

</bundles_post_ra>
